<compile_context>
chip_gen: v5e
topology: v5e:2x2
jax: 0.10.0
libtpu: 0.0.40
codegen_flags: <defaults>
</compile_context>

<pallas_src>
import functools
import math

import jax
import jax.numpy as jnp
import numpy as np
from jax import lax
from jax.experimental import pallas as pl
from jax.experimental.pallas import tpu as pltpu

_HIGHEST = jax.lax.Precision.HIGHEST


# ----------------------------------------------------------------------------
# Kernel 1: row-tiled linear layer  y = x @ W + b
# ----------------------------------------------------------------------------
def _linear_kernel(x_ref, w_ref, b_ref, o_ref):
    o_ref[...] = (
        jnp.dot(
            x_ref[...],
            w_ref[...],
            preferred_element_type=jnp.float32,
            precision=_HIGHEST,
        )
        + b_ref[...]
    )


def linear(x, w, b, *, block_rows=128):
    """x: (N, Din) f32, w: (Din, Dout) f32, b: (Dout,) f32 -> (N, Dout) f32.

    N must be a multiple of block_rows (the caller pads the sequence once).
    """
    n, d_in = x.shape
    d_out = w.shape[1]
    assert n % block_rows == 0, (n, block_rows)
    return pl.pallas_call(
        _linear_kernel,
        out_shape=jax.ShapeDtypeStruct((n, d_out), jnp.float32),
        grid_spec=pltpu.PrefetchScalarGridSpec(
            num_scalar_prefetch=0,
            grid=(n // block_rows,),
            in_specs=[
                pl.BlockSpec((block_rows, d_in), lambda i: (i, 0)),
                pl.BlockSpec((d_in, d_out), lambda i: (0, 0)),
                pl.BlockSpec((1, d_out), lambda i: (0, 0)),
            ],
            out_specs=pl.BlockSpec((block_rows, d_out), lambda i: (i, 0)),
        ),
        compiler_params=pltpu.CompilerParams(dimension_semantics=("parallel",)),
    )(x, w, b.reshape(1, d_out))


# ----------------------------------------------------------------------------
# Kernel 2: fused banded (limited-span) multi-head attention
# ----------------------------------------------------------------------------
def _band_attn_kernel(q_ref, k_ref, v_ref, fq_ref, fk_ref, o_ref, *,
                      span, n_valid, scale):
    qi = pl.program_id(0)
    q = q_ref[...]            # (H, block_q, Dh)
    k = k_ref[...]            # (H, n_pad,  Dh)
    v = v_ref[...]            # (H, n_pad,  Dh)
    fq = fq_ref[...]          # (H, block_q, Dh)
    fk = fk_ref[...]          # (H, n_pad,  Dh)
    block_q = q.shape[1]
    n_pad = k.shape[1]

    # Scaled q.k plus the bias-feature inner product, for all heads at once.
    s = jnp.einsum("hqd,hkd->hqk", q, k,
                   preferred_element_type=jnp.float32, precision=_HIGHEST)
    s = s * scale
    s = s + jnp.einsum("hqd,hkd->hqk", fq, fk,
                       preferred_element_type=jnp.float32, precision=_HIGHEST)

    # Band (|i - j| <= span) and key-padding masks.
    row = qi * block_q + lax.broadcasted_iota(jnp.int32, (block_q, n_pad), 0)
    col = lax.broadcasted_iota(jnp.int32, (block_q, n_pad), 1)
    off = col - row
    mask = (off >= -span) & (off <= span) & (col < n_valid)
    # Finite fill (instead of -inf) keeps fully-masked padded query rows
    # NaN-free; those rows are sliced off by the wrapper anyway.
    s = jnp.where(mask[None, :, :], s, -1e30)

    # Softmax over keys.
    m = jnp.max(s, axis=-1, keepdims=True)
    p = jnp.exp(s - m)
    p = p / jnp.sum(p, axis=-1, keepdims=True)

    # Attention-weighted values.
    o_ref[...] = jnp.einsum("hqk,hkd->hqd", p, v,
                            preferred_element_type=jnp.float32,
                            precision=_HIGHEST)


def band_attention(q, k, v, fb, *, span, n_valid, block_q=128):
    """q, k, v, fb: (H, n_pad, Dh) f32 -> banded attention output (H, n_pad, Dh)."""
    num_heads, n_pad, head_dim = q.shape
    assert n_pad % block_q == 0, (n_pad, block_q)
    scale = 1.0 / math.sqrt(n_valid)   # PyTorch divides by sqrt(n), not sqrt(Dh)
    kernel = functools.partial(_band_attn_kernel, span=span,
                               n_valid=n_valid, scale=scale)
    q_tile = pl.BlockSpec((num_heads, block_q, head_dim), lambda i: (0, i, 0))
    kv_full = pl.BlockSpec((num_heads, n_pad, head_dim), lambda i: (0, 0, 0))
    return pl.pallas_call(
        kernel,
        out_shape=jax.ShapeDtypeStruct((num_heads, n_pad, head_dim), jnp.float32),
        grid_spec=pltpu.PrefetchScalarGridSpec(
            num_scalar_prefetch=0,
            grid=(n_pad // block_q,),
            in_specs=[q_tile, kv_full, kv_full, q_tile, kv_full],
            out_specs=pl.BlockSpec((num_heads, block_q, head_dim),
                                   lambda i: (0, i, 0)),
        ),
        compiler_params=pltpu.CompilerParams(dimension_semantics=("parallel",)),
    )(q, k, v, fb, fb)


# ----------------------------------------------------------------------------
# Module forward pass (Pallas) and pure-JAX reference
# ----------------------------------------------------------------------------
def sparse_mha_forward(params, query, key, value, attn_bias, *,
                       num_heads, attn_span=50, block_q=128):
    """Pallas forward pass of SparseMultiheadAttention (eval mode, dropout p=0)."""
    n, embed_dim = query.shape
    if key.shape[0] != value.shape[0]:
        raise ValueError("key and value must have same length")
    head_dim = embed_dim // num_heads

    # Pad the sequence once to a multiple of block_q (sublane/lane friendly);
    # padded key columns are masked inside the attention kernel and padded
    # query rows are sliced off at the end.
    n_pad = ((n + block_q - 1) // block_q) * block_q
    pad = n_pad - n

    def pad_rows(x):
        x = x.astype(jnp.float32)
        return jnp.pad(x, ((0, pad), (0, 0))) if pad else x

    q_in, k_in, v_in, b_in = map(pad_rows, (query, key, value, attn_bias))

    q = linear(q_in, params["wq"], params["bq"], block_rows=block_q)
    k = linear(k_in, params["wk"], params["bk"], block_rows=block_q)
    v = linear(v_in, params["wv"], params["bv"], block_rows=block_q)
    fb = linear(b_in, params["wf"], params["bf"], block_rows=block_q)

    def split_heads(x):   # (n_pad, H*Dh) -> (H, n_pad, Dh)
        return x.reshape(n_pad, num_heads, head_dim).transpose(1, 0, 2)

    attn = band_attention(split_heads(q), split_heads(k), split_heads(v),
                          split_heads(fb), span=attn_span, n_valid=n,
                          block_q=block_q)

    merged = attn.transpose(1, 0, 2).reshape(n_pad, num_heads * head_dim)
    out = linear(merged, params["wo"], params["bo"], block_rows=block_q)
    return out[:n]


def sparse_mha_reference(params, query, key, value, attn_bias, *,
                         num_heads, attn_span=50):
    """Pure-JAX reference mirroring SparseMultiheadAttention.forward.

    The PyTorch code gathers a (2*span+1)-wide window per query and softmaxes
    over it with out-of-range positions at -inf; that is mathematically
    identical to dense attention under the band mask |i - j| <= span.
    """
    n, embed_dim = query.shape
    head_dim = embed_dim // num_heads

    def lin(x, w, b):
        return jnp.dot(x.astype(jnp.float32), w, precision=_HIGHEST) + b

    def split_heads(x):
        return x.reshape(n, num_heads, head_dim).transpose(1, 0, 2)

    q = split_heads(lin(query, params["wq"], params["bq"]))
    k = split_heads(lin(key, params["wk"], params["bk"]))
    v = split_heads(lin(value, params["wv"], params["bv"]))
    fb = split_heads(lin(attn_bias, params["wf"], params["bf"]))

    s = jnp.einsum("hid,hjd->hij", q, k, precision=_HIGHEST) / math.sqrt(n)
    s = s + jnp.einsum("hid,hjd->hij", fb, fb, precision=_HIGHEST)
    i = jnp.arange(n)[:, None]
    j = jnp.arange(n)[None, :]
    band = jnp.abs(i - j) <= attn_span
    s = jnp.where(band[None, :, :], s, -jnp.inf)
    p = jax.nn.softmax(s, axis=-1)
    o = jnp.einsum("hij,hjd->hid", p, v, precision=_HIGHEST)
    merged = o.transpose(1, 0, 2).reshape(n, num_heads * head_dim)
    return jnp.dot(merged, params["wo"], precision=_HIGHEST) + params["bo"]


def init_params(rng, embed_dim, num_heads):
    """Xavier-uniform weights (stored (in, out)); nn.Linear-style biases."""
    def xavier(k, shape):
        bound = math.sqrt(6.0 / (shape[0] + shape[1]))
        return jax.random.uniform(k, shape, jnp.float32, -bound, bound)

    def lin_bias(k, fan_in, size):
        bound = 1.0 / math.sqrt(fan_in)
        return jax.random.uniform(k, (size,), jnp.float32, -bound, bound)

    e, h = embed_dim, num_heads
    ks = jax.random.split(rng, 10)
    return {
        "wq": xavier(ks[0], (e, e)), "bq": lin_bias(ks[1], e, e),
        "wk": xavier(ks[2], (e, e)), "bk": lin_bias(ks[3], e, e),
        "wv": xavier(ks[4], (e, e)), "bv": lin_bias(ks[5], e, e),
        "wf": xavier(ks[6], (h, e)), "bf": lin_bias(ks[7], h, e),
        "wo": xavier(ks[8], (e, e)), "bo": lin_bias(ks[9], e, e),
    }


if __name__ == "__main__":
    embed_dim = 32
    num_heads = 4
    attn_span = 50
    seq_len = 200   # exercises band edges and row/column padding (n_pad = 256)

    root = jax.random.PRNGKey(0)
    k_par, k_q, k_k, k_v, k_b = jax.random.split(root, 5)
    params = init_params(k_par, embed_dim, num_heads)
    query = jax.random.normal(k_q, (seq_len, embed_dim), jnp.float32)
    key_in = jax.random.normal(k_k, (seq_len, embed_dim), jnp.float32)
    value_in = jax.random.normal(k_v, (seq_len, embed_dim), jnp.float32)
    attn_bias = jax.random.normal(k_b, (seq_len, num_heads), jnp.float32)

    out = sparse_mha_forward(params, query, key_in, value_in, attn_bias,
                             num_heads=num_heads, attn_span=attn_span)
    out = jax.block_until_ready(out)

    ref = sparse_mha_reference(params, query, key_in, value_in, attn_bias,
                               num_heads=num_heads, attn_span=attn_span)
    assert out.shape == (seq_len, embed_dim), out.shape
    np.testing.assert_allclose(np.asarray(out), np.asarray(ref),
                               rtol=2e-3, atol=2e-3)
    print("KERNEL_OK")
</pallas_src>

<mosaic_0001>
module attributes {stable_mosaic.version = 11 : i64} {
  func.func @_linear_kernel(%arg0: i32, %arg1: memref<128x32xf32, #tpu.memory_space<vmem>>, %arg2: memref<32x32xf32, #tpu.memory_space<vmem>>, %arg3: memref<1x32xf32, #tpu.memory_space<vmem>>, %arg4: memref<128x32xf32, #tpu.memory_space<vmem>>) attributes {dimension_semantics = [#tpu.dimension_semantics<parallel>], iteration_bounds = array<i64: 2>, scalar_prefetch = 0 : i64, scratch_operands = 0 : i64, tpu.core_type = #tpu.core_type<tc>, window_params = [{transform_indices = @transform_0, window_bounds = array<i64: 128, 32>}, {pipeline_mode = #tpu.pipeline_mode<synchronous>, transform_indices = @transform_1, window_bounds = array<i64: 32, 32>}, {pipeline_mode = #tpu.pipeline_mode<synchronous>, transform_indices = @transform_2, window_bounds = array<i64: 1, 32>}, {transform_indices = @transform_3, window_bounds = array<i64: 128, 32>}]} {
    %c0 = arith.constant 0 : index
    %c0_0 = arith.constant 0 : index
    %0 = vector.load %arg1[%c0, %c0_0] : memref<128x32xf32, #tpu.memory_space<vmem>>, vector<128x32xf32>
    %c0_1 = arith.constant 0 : index
    %c0_2 = arith.constant 0 : index
    %1 = vector.load %arg2[%c0_1, %c0_2] : memref<32x32xf32, #tpu.memory_space<vmem>>, vector<32x32xf32>
    %cst = arith.constant dense<0.000000e+00> : vector<128x32xf32>
    %2 = tpu.matmul %0, %1, %cst {dimension_numbers = #tpu.dot_dimension_numbers<[1], [0], [0], [1], [0, 0, 1, 1], [], []>, precision = #tpu.contract_precision<fp32>} : vector<128x32xf32>, vector<32x32xf32>, vector<128x32xf32> -> vector<128x32xf32>
    %c0_3 = arith.constant 0 : index
    %c0_4 = arith.constant 0 : index
    %3 = vector.load %arg3[%c0_3, %c0_4] : memref<1x32xf32, #tpu.memory_space<vmem>>, vector<1x32xf32>
    %4 = vector.broadcast %3 : vector<1x32xf32> to vector<128x32xf32>
    %5 = arith.addf %2, %4 : vector<128x32xf32>
    %c0_5 = arith.constant 0 : index
    %c0_6 = arith.constant 0 : index
    %6 = vector.load %arg4[%c0_5, %c0_6] : memref<128x32xf32, #tpu.memory_space<vmem>>, vector<128x32xf32>
    tpu.vector_store %arg4[%c0_5, %c0_6], %5 {strides = array<i32>} : memref<128x32xf32, #tpu.memory_space<vmem>>, vector<128x32xf32>,
    return
  }
  func.func @transform_0(%arg0: i32) -> (i32, i32) {
    %c0_i32 = arith.constant 0 : i32
    %c0_i32_0 = arith.constant 0 : i32
    return %arg0, %c0_i32 : i32, i32
  }
  func.func @transform_1(%arg0: i32) -> (i32, i32) {
    %c0_i32 = arith.constant 0 : i32
    %c0_i32_0 = arith.constant 0 : i32
    %c0_i32_1 = arith.constant 0 : i32
    return %c0_i32, %c0_i32_0 : i32, i32
  }
  func.func @transform_2(%arg0: i32) -> (i32, i32) {
    %c0_i32 = arith.constant 0 : i32
    %c0_i32_0 = arith.constant 0 : i32
    %c0_i32_1 = arith.constant 0 : i32
    return %c0_i32, %c0_i32_0 : i32, i32
  }
  func.func @transform_3(%arg0: i32) -> (i32, i32) {
    %c0_i32 = arith.constant 0 : i32
    %c0_i32_0 = arith.constant 0 : i32
    return %arg0, %c0_i32 : i32, i32
  }
}

</mosaic_0001>

<bundles_post_ra>
// kernel: tpu_custom_call.1
= control target key start
LH: loop header
LB: loop body
LE: loop exit
PB: predicated region body
PF: predicated region fallthrough
CT: control target
= control target key end

     0   :  { %s1025_s12 = smov 0   ;;  %s1471_s0 = inlined_call_operand.vmem [shape: f32[256,32], index: 0, kind: input, shape index: {}]   ;;  %s1472_s1 = inlined_call_operand.vmem [shape: f32[32,32], index: 1, kind: input, shape index: {}]   ;;  %s1473_s2 = inlined_call_operand.vmem [shape: f32[1,32], index: 2, kind: input, shape index: {}]   ;;  %s1474_s3 = inlined_call_operand.vmem [shape: f32[256,32], index: 3, kind: output, shape index: {}]  }
   0x1 LB: > { %s969_s13 = sadd.s32 4294967295, %s1003_s12   ;;  %p973_p0 = scmp.ge.s32.totalorder %s1003_s12, 1  ;;  %s1003_s12 = sphi %s1025_s12, %s13_s12  }
   0x2   : > { %p138_p1 = scmp.lt.s32.totalorder %s1003_s12, 3 }
   0x4   : > { %p139_p2 = pnand %p973_p0, %p138_p1 }
   0x5   : > { %s974_s20 = sshll.u32 (!%p139_p2), %s969_s13, 4 }
   0x6   : > { %142 = sbr.rel (%p139_p2) target bundleno = 356 (0x164), region = 32  ;;  %p163_p3 = scmp.lt.s32.totalorder (!%p139_p2), %s974_s20, 31 }
   0xb   : > { %v193_v0 = vld [vmem:[%s1472_s1 + $0x18] sm:$0xff]  ;;  %v192_v1 = vld [vmem:[%s1472_s1 + $0x10] sm:$0xff]  ;;  %v191_v2 = vld [vmem:[%s1472_s1 + $0x8] sm:$0xff]  ;;  %s1476_s20 = smov (!%p163_p3, %s974_s20), 31  ;;  %vm198_vm0 = vcmask 261120  }
   0xc   : > { %v1042_v3 = vand.u32 4294901760, %v193_v0  ;;  %v1044_v4 = vand.u32 4294901760, %v192_v1  ;;  %v1046_v5 = vand.u32 4294901760, %v191_v2  ;;  %v190_v6 = vld [vmem:[%s1472_s1] sm:$0xff]  ;;  %s975_s23 = sshll.u32 %s1476_s20, 3 }
   0xd   : > { %v1051_v7 = vand.u32 4294901760, %v190_v6  ;;  %s1071_s26 = scalar_lea.vmem %s1471_s0, %s975_s23  ;;  %s1407_s4 = scalar_lea.vmem %s1474_s3, %s975_s23 }
   0xe   : > { %980 = vmatpush.msra.mxu2 %v1042_v3  ;;  %v409_v8 = vsub.f32 %v193_v0, %v1042_v3  ;;  %v415_v9 = vsub.f32 %v192_v1, %v1044_v4  ;;  %v421_v10 = vsub.f32 %v191_v2, %v1046_v5  ;;  %260 = vmatpush.msra.mxu0 %v1042_v3  ;;  %v182_v19 = vld [vmem:[%s1071_s26 + $0x40] sm:$0xff]  ;;  %v183_v20 = vld [vmem:[%s1071_s26 + $0x48] sm:$0xff]  ;;  %v184_v30 = vld [vmem:[%s1071_s26 + $0x50] sm:$0xff] }
   0xf   : > { %v1061_v11 = vsub.f32 %v190_v6, %v1051_v7  ;;  %v174_v21 = vld [vmem:[%s1071_s26] sm:$0xff]  ;;  %v224_v22 = vsel %vm198_vm0, %v182_v19, 0  ;;  %v227_v23 = vsel %vm198_vm0, %v183_v20, 0  ;;  %v175_v25 = vld [vmem:[%s1071_s26 + $0x8] sm:$0xff]  ;;  %v176_v33 = vld [vmem:[%s1071_s26 + $0x10] sm:$0xff]  ;;  %v230_v39 = vsel %vm198_vm0, %v184_v30, 0 }
  0x10   : > { %981 = vmatpush.msra.mxu2 %v1044_v4  ;;  %v410_v12 = vand.u32 4294901760, %v409_v8  ;;  %v416_v13 = vand.u32 4294901760, %v415_v9  ;;  %v422_v14 = vand.u32 4294901760, %v421_v10  ;;  %262 = vmatpush.msra.mxu0 %v1044_v4  ;;  %v200_v24 = vsel %vm198_vm0, %v174_v21, 0  ;;  %v185_v53 = vld [vmem:[%s1071_s26 + $0x58] sm:$0xff]  ;;  %v186_v6 = vld [vmem:[%s1071_s26 + $0x60] sm:$0xff] }
  0x11   : > { %v428_v15 = vand.u32 4294901760, %v1061_v11  ;;  %v1084_v28 = vand.u32 4294901760, %v224_v22  ;;  %v1089_v31 = vand.u32 4294901760, %v227_v23  ;;  %v1091_v32 = vand.u32 4294901760, %v200_v24  ;;  %v177_v55 = vld [vmem:[%s1071_s26 + $0x18] sm:$0xff]  ;;  %v179_v19 = vld [vmem:[%s1071_s26 + $0x28] sm:$0xff] }
  0x12   : > { %v411_v16 = vsub.f32 %v409_v8, %v410_v12  ;;  %982 = vmatpush.msra.mxu2 %v1046_v5  ;;  %v417_v17 = vsub.f32 %v415_v9, %v416_v13  ;;  %v423_v18 = vsub.f32 %v421_v10, %v422_v14  ;;  %264 = vmatpush.msra.mxu0 %v1046_v5  ;;  %v203_v36 = vsel %vm198_vm0, %v175_v25, 0 }
  0x13   : > { %v429_v29 = vsub.f32 %v1061_v11, %v428_v15  ;;  %v1095_v35 = vsub.f32 %v224_v22, %v1084_v28  ;;  %v1099_v37 = vsub.f32 %v227_v23, %v1089_v31  ;;  %v1102_v38 = vsub.f32 %v200_v24, %v1091_v32 }
  0x14   : > { %v412_v26 = vand.u32 4294901760, %v411_v16  ;;  %v418_v27 = vand.u32 4294901760, %v417_v17  ;;  %983 = vmatpush.msra.mxu2 %v1051_v7  ;;  %266 = vmatpush.msra.mxu0 %v1051_v7  ;;  %v424_v34 = vand.u32 4294901760, %v423_v18  ;;  %v1105_v40 = vand.u32 4294901760, %v203_v36  ;;  %v187_v18 = vld [vmem:[%s1071_s26 + $0x68] sm:$0xff] }
  0x15   : > { %v333_v41 = vand.u32 4294901760, %v1095_v35  ;;  %v430_v42 = vand.u32 4294901760, %v429_v29  ;;  %v206_v43 = vsel %vm198_vm0, %v176_v33, 0  ;;  %v269_v44 = vand.u32 4294901760, %v1102_v38 }
  0x16   : > { %511 = vmatpush.msrb.mxu2 %v409_v8  ;;  %734 = vmatpush.msrb.mxu0 %v410_v12  ;;  %v1111_v45 = vsub.f32 %v203_v36, %v1105_v40  ;;  %v341_v47 = vand.u32 4294901760, %v1099_v37  ;;  %v1117_v48 = vand.u32 4294901760, %v230_v39  ;;  %v1123_v51 = vand.u32 4294901760, %v206_v43  ;;  %v188_v36 = vld [vmem:[%s1071_s26 + $0x70] sm:$0xff] }
  0x17   : > { %984 = vmatpush.msra.mxu3 %v412_v26  ;;  %413 = vmatpush.msra.mxu1 %v412_v26  ;;  %v334_v46 = vsub.f32 %v1095_v35, %v333_v41  ;;  %v270_v49 = vsub.f32 %v1102_v38, %v269_v44  ;;  %v233_v59 = vsel %vm198_vm0, %v185_v53, 0  ;;  %v209_v61 = vsel %vm198_vm0, %v177_v55, 0 }
  0x18   : > { %514 = vmatpush.msrb.mxu2 %v415_v9  ;;  %738 = vmatpush.msrb.mxu0 %v416_v13  ;;  %v277_v50 = vand.u32 4294901760, %v1111_v45  ;;  %v342_v56 = vsub.f32 %v1099_v37, %v341_v47  ;;  %v1135_v57 = vsub.f32 %v230_v39, %v1117_v48  ;;  %v1143_v60 = vsub.f32 %v206_v43, %v1123_v51  ;;  %v180_v39 = vld [vmem:[%s1071_s26 + $0x30] sm:$0xff] }
  0x19   : > { %985 = vmatpush.msra.mxu3 %v418_v27  ;;  %419 = vmatpush.msra.mxu1 %v418_v27  ;;  %v335_v52 = vand.u32 4294901760, %v334_v46  ;;  %v271_v54 = vand.u32 4294901760, %v270_v49  ;;  %v1149_v0 = vand.u32 4294901760, %v233_v59  ;;  %v239_v23 = vsel %vm198_vm0, %v187_v18, 0 }
  0x1a   : > { %517 = vmatpush.msrb.mxu2 %v421_v10  ;;  %742 = vmatpush.msrb.mxu0 %v422_v14  ;;  %v278_v58 = vsub.f32 %v1111_v45, %v277_v50  ;;  %v343_v62 = vand.u32 4294901760, %v342_v56  ;;  %v349_v63 = vand.u32 4294901760, %v1135_v57  ;;  %v285_v2 = vand.u32 4294901760, %v1143_v60 }
  0x1b   : > { %986 = vmatpush.msra.mxu3 %v424_v34  ;;  %425 = vmatpush.msra.mxu1 %v424_v34  ;;  %v1165_v9 = vsub.f32 %v233_v59, %v1149_v0  ;;  %v236_v10 = vsel %vm198_vm0, %v186_v6, 0  ;;  %v215_v25 = vsel %vm198_vm0, %v179_v19, 0  ;;  %v1201_v29 = vand.u32 4294901760, %v239_v23 }
  0x1c   : > { %520 = vmatpush.msrb.mxu2 %v1061_v11  ;;  %746 = vmatpush.msrb.mxu0 %v428_v15  ;;  %v279_v1 = vand.u32 4294901760, %v278_v58  ;;  %v350_v8 = vsub.f32 %v1135_v57, %v349_v63  ;;  %v1177_v15 = vand.u32 4294901760, %v236_v10  ;;  %v1204_v34 = vand.u32 4294901760, %v215_v25 }
  0x1d   : > { %987 = vmatpush.msra.mxu3 %v430_v42  ;;  %431 = vmatpush.msra.mxu1 %v430_v42  ;;  %v357_v14 = vand.u32 4294901760, %v1165_v9  ;;  %v1214_v43 = vsub.f32 %v239_v23, %v1201_v29  ;;  %v242_v49 = vsel %vm198_vm0, %v188_v36, 0  ;;  %v218_v53 = vsel %vm198_vm0, %v180_v39, 0 }
  0x1e   : > { %465 = vmatmul.f32.vlgmr.msra.gmra.mxu3 %v1084_v28  ;;  %433 = vmatmul.f32.vlgmr.msra.gmra.mxu1 %v1091_v32  ;;  %v351_v13 = vand.u32 4294901760, %v350_v8  ;;  %v1190_v21 = vsub.f32 %v236_v10, %v1177_v15  ;;  %v1225_v56 = vand.u32 4294901760, %v242_v49 }
  0x1f   : > { %336 = vmatmul.f32.vlgmr.msra.gmra.mxu2 %v335_v52  ;;  %615 = vmatpush.msrb.mxu3 %v1042_v3  ;;  %v358_v20 = vsub.f32 %v1165_v9, %v357_v14  ;;  %v1221_v52 = vsub.f32 %v215_v25, %v1204_v34  ;;  %v373_v55 = vand.u32 4294901760, %v1214_v43 }
  0x20   : > { %272 = vmatmul.f32.vlgmr.msra.gmra.mxu0 %v271_v54  ;;  %825 = vmatpush.msrb.mxu1 %v1042_v3  ;;  %v1153_v3 = vand.u32 4294901760, %v209_v61  ;;  %v365_v27 = vand.u32 4294901760, %v1190_v21 }
  0x21   : > { %617 = vmatpush.msrb.mxu3 %v1044_v4  ;;  %v359_v26 = vand.u32 4294901760, %v358_v20  ;;  %v309_v59 = vand.u32 4294901760, %v1221_v52  ;;  %v374_v6 = vsub.f32 %v1214_v43, %v373_v55 }
  0x22   : > { %827 = vmatpush.msrb.mxu1 %v1044_v4  ;;  %v178_v4 = vld [vmem:[%s1071_s26 + $0x20] sm:$0xff]  ;;  %v1173_v11 = vsub.f32 %v209_v61, %v1153_v3  ;;  %v366_v42 = vsub.f32 %v1190_v21, %v365_v27  ;;  %v1228_v61 = vand.u32 4294901760, %v218_v53 }
  0x23   : > { %619 = vmatpush.msrb.mxu3 %v1046_v5  ;;  %v212_v12 = vsel %vm198_vm0, %v178_v4, 0  ;;  %v1238_v4 = vsub.f32 %v242_v49, %v1225_v56  ;;  %v310_v8 = vsub.f32 %v1221_v52, %v309_v59 }
  0x24   : > { %829 = vmatpush.msrb.mxu1 %v1046_v5  ;;  %v286_v5 = vsub.f32 %v1143_v60, %v285_v2  ;;  %v1180_v17 = vand.u32 4294901760, %v212_v12  ;;  %v367_v54 = vand.u32 4294901760, %v366_v42  ;;  %v316_v10 = vsub.f32 %v218_v53, %v1228_v61 }
  0x25   : > { %621 = vmatpush.msrb.mxu3 %v1051_v7  ;;  %v311_v19 = vand.u32 4294901760, %v310_v8 }
  0x26   : > { %469 = vmatmul.f32.gmra.mxu3 %v1089_v31  ;;  %437 = vmatmul.f32.gmra.mxu1 %v1105_v40  ;;  %v287_v16 = vand.u32 4294901760, %v286_v5  ;;  %v1197_v24 = vsub.f32 %v212_v12, %v1180_v17  ;;  %v317_v20 = vand.u32 4294901760, %v316_v10 }
  0x27   : > { %344 = vmatmul.f32.gmra.mxu2 %v343_v62  ;;  %831 = vmatpush.msrb.mxu1 %v1051_v7  ;;  %v293_v7 = vand.u32 4294901760, %v1173_v11  ;;  %v189_v62 = vld [vmem:[%s1071_s26 + $0x78] sm:$0xff] }
  0x28   : > { %280 = vmatmul.f32.gmra.mxu0 %v279_v1  ;;  %v301_v33 = vand.u32 4294901760, %v1197_v24  ;;  %v181_v1 = vld [vmem:[%s1071_s26 + $0x38] sm:$0xff]  ;;  %v245_v5 = vsel %vm198_vm0, %v189_v62, 0 }
  0x29   : > { %v294_v22 = vsub.f32 %v1173_v11, %v293_v7  ;;  %v221_v12 = vsel %vm198_vm0, %v181_v1, 0  ;;  %v1247_v18 = vand.u32 4294901760, %v245_v5 }
  0x2a   : > { %v302_v46 = vsub.f32 %v1197_v24, %v301_v33 }
  0x2b   : > { %v295_v30 = vand.u32 4294901760, %v294_v22  ;;  %v323_v22 = vand.u32 4294901760, %v221_v12  ;;  %v1255_v25 = vsub.f32 %v245_v5, %v1247_v18 }
  0x2c   : > { %v303_v58 = vand.u32 4294901760, %v302_v46 }
  0x2d   : > { %v389_v39 = vand.u32 4294901760, %v1255_v25 }
  0x2e   : > { %473 = vmatmul.f32.gmra.mxu3 %v1117_v48  ;;  %441 = vmatmul.f32.gmra.mxu1 %v1123_v51 }
  0x2f   : > { %352 = vmatmul.f32.gmra.mxu2 %v351_v13  ;;  %v375_v13 = vand.u32 4294901760, %v374_v6  ;;  %v390_v49 = vsub.f32 %v1255_v25, %v389_v39 }
  0x30   : > { %288 = vmatmul.f32.gmra.mxu0 %v287_v16  ;;  %v381_v16 = vand.u32 4294901760, %v1238_v4 }
  0x32   : > { %v382_v23 = vsub.f32 %v1238_v4, %v381_v16 }
  0x34   : > { %v383_v36 = vand.u32 4294901760, %v382_v23 }
  0x36   : > { %477 = vmatmul.f32.gmra.mxu3 %v1149_v0  ;;  %445 = vmatmul.f32.gmra.mxu1 %v1153_v3 }
  0x37   : > { %360 = vmatmul.f32.gmra.mxu2 %v359_v26  ;;  %v318_v26 = vsub.f32 %v316_v10, %v317_v20 }
  0x38   : > { %296 = vmatmul.f32.gmra.mxu0 %v295_v30  ;;  %v324_v30 = vsub.f32 %v221_v12, %v323_v22 }
  0x39   : > { %v319_v42 = vand.u32 4294901760, %v318_v26 }
  0x3a   : > { %v325_v46 = vand.u32 4294901760, %v324_v30 }
  0x3c   : > { %v326_v53 = vsub.f32 %v324_v30, %v325_v46 }
  0x3e   : > { %481 = vmatmul.f32.gmra.mxu3 %v1177_v15  ;;  %449 = vmatmul.f32.gmra.mxu1 %v1180_v17 }
  0x3f   : > { %368 = vmatmul.f32.gmra.mxu2 %v367_v54  ;;  %v391_v54 = vand.u32 4294901760, %v390_v49 }
  0x40   : > { %304 = vmatmul.f32.gmra.mxu0 %v303_v58  ;;  %v327_v58 = vand.u32 4294901760, %v326_v53 }
  0x46   : > { %485 = vmatmul.f32.gmra.mxu3 %v1201_v29  ;;  %453 = vmatmul.f32.gmra.mxu1 %v1204_v34 }
  0x47   : > { %376 = vmatmul.f32.gmra.mxu2 %v375_v13 }
  0x48   : > { %312 = vmatmul.f32.gmra.mxu0 %v311_v19 }
  0x4e   : > { %489 = vmatmul.f32.gmra.mxu3 %v1225_v56  ;;  %457 = vmatmul.f32.gmra.mxu1 %v1228_v61 }
  0x4f   : > { %384 = vmatmul.f32.gmra.mxu2 %v383_v36 }
  0x50   : > { %320 = vmatmul.f32.gmra.mxu0 %v319_v42 }
  0x56   : > { %493 = vmatmul.f32.gmra.mxu3 %v1247_v18  ;;  %461 = vmatmul.f32.gmra.mxu1 %v323_v22 }
  0x57   : > { %392 = vmatmul.f32.gmra.mxu2 %v391_v54 }
  0x58   : > { %328 = vmatmul.f32.gmra.mxu0 %v327_v58 }
  0x5e   : > { %625 = vmatmul.f32.vlgmr.msrb.gmra.mxu3 %v269_v44  ;;  %833 = vmatmul.f32.vlgmr.msrb.gmra.mxu1 %v1091_v32 }
  0x5f   : > { %523 = vmatmul.f32.vlgmr.msrb.gmra.mxu2 %v1102_v38 }
  0x60   : > { %748 = vmatmul.f32.vlgmr.msrb.gmra.mxu0 %v1091_v32 }
  0x66   : > { %631 = vmatmul.f32.gmra.mxu3 %v277_v50  ;;  %837 = vmatmul.f32.gmra.mxu1 %v1105_v40 }
  0x67   : > { %528 = vmatmul.f32.gmra.mxu2 %v1111_v45 }
  0x68   : > { %752 = vmatmul.f32.gmra.mxu0 %v1105_v40  ;;  %v1307_v40 = vld [vmem:[%s1473_s2] ss:$0 sm:$0xff] }
  0x6e   : > { %637 = vmatmul.f32.gmra.mxu3 %v285_v2  ;;  %841 = vmatmul.f32.gmra.mxu1 %v1123_v51 }
  0x6f   : > { %533 = vmatmul.f32.gmra.mxu2 %v1143_v60 }
  0x70   : > { %756 = vmatmul.f32.gmra.mxu0 %v1123_v51 }
  0x76   : > { %643 = vmatmul.f32.gmra.mxu3 %v293_v7  ;;  %845 = vmatmul.f32.gmra.mxu1 %v1153_v3 }
  0x77   : > { %538 = vmatmul.f32.gmra.mxu2 %v1173_v11 }
  0x78   : > { %760 = vmatmul.f32.gmra.mxu0 %v1153_v3 }
  0x7e   : > { %649 = vmatmul.f32.gmra.mxu3 %v301_v33  ;;  %849 = vmatmul.f32.gmra.mxu1 %v1180_v17 }
  0x7f   : > { %543 = vmatmul.f32.gmra.mxu2 %v1197_v24 }
  0x80   : > { %764 = vmatmul.f32.gmra.mxu0 %v1180_v17 }
  0x86   : > { %655 = vmatmul.f32.gmra.mxu3 %v309_v59  ;;  %853 = vmatmul.f32.gmra.mxu1 %v1204_v34 }
  0x87   : > { %548 = vmatmul.f32.gmra.mxu2 %v1221_v52 }
  0x88   : > { %768 = vmatmul.f32.gmra.mxu0 %v1204_v34 }
  0x8e   : > { %661 = vmatmul.f32.gmra.mxu3 %v317_v20  ;;  %857 = vmatmul.f32.gmra.mxu1 %v1228_v61 }
  0x8f   : > { %553 = vmatmul.f32.gmra.mxu2 %v316_v10 }
  0x90   : > { %772 = vmatmul.f32.gmra.mxu0 %v1228_v61 }
  0x96   : > { %667 = vmatmul.f32.gmra.mxu3 %v325_v46  ;;  %861 = vmatmul.f32.gmra.mxu1 %v323_v22 }
  0x97   : > { %558 = vmatmul.f32.gmra.mxu2 %v324_v30 }
  0x98   : > { %776 = vmatmul.f32.gmra.mxu0 %v323_v22 }
  0x9b   : > { %v1296_v32 = vpop.f32.mrf.mxu1 }
  0x9d   : > { %v1298_v38 = vpop.f32.mrf.mxu0 }
  0x9e   : > { %673 = vmatmul.f32.gmra.mxu3 %v333_v41  ;;  %865 = vmatmul.f32.gmra.mxu1 %v1084_v28  ;;  %v274_v20 = vadd.f32 %v1307_v40, %v1298_v38 }
  0x9f   : > { %563 = vmatmul.f32.gmra.mxu2 %v1095_v35 }
  0xa0   : > { %780 = vmatmul.f32.gmra.mxu0 %v1084_v28  ;;  %v435_v26 = vadd.f32 %v1296_v32, %v274_v20 }
  0xa1   : > { %v466_v44 = vpop.f32.mrf.mxu3 }
  0xa2   : > { %v337_v45 = vpop.f32.mrf.mxu2 }
  0xa3   : > { %v338_v50 = vadd.f32 %v1307_v40, %v337_v45  ;;  %v1311_v51 = vpop.f32.mrf.mxu1 }
  0xa5   : > { %v1313_v60 = vadd.f32 %v466_v44, %v338_v50  ;;  %v1315_v41 = vpop.f32.mrf.mxu0 }
  0xa6   : > { %679 = vmatmul.f32.gmra.mxu3 %v341_v47  ;;  %869 = vmatmul.f32.gmra.mxu1 %v1089_v31 }
  0xa7   : > { %568 = vmatmul.f32.gmra.mxu2 %v1099_v37 }
  0xa8   : > { %784 = vmatmul.f32.gmra.mxu0 %v1089_v31 }
  0xa9   : > { %v470_v28 = vpop.f32.mrf.mxu3 }
  0xaa   : > { %v345_v35 = vpop.f32.mrf.mxu2 }
  0xab   : > { %v346_v2 = vadd.f32 %v1307_v40, %v345_v35  ;;  %v1323_v3 = vpop.f32.mrf.mxu1 }
  0xad   : > { %v1325_v11 = vadd.f32 %v470_v28, %v346_v2  ;;  %v1327_v7 = vpop.f32.mrf.mxu0 }
  0xae   : > { %685 = vmatmul.f32.gmra.mxu3 %v349_v63  ;;  %873 = vmatmul.f32.gmra.mxu1 %v1117_v48  ;;  %v290_v45 = vadd.f32 %v1307_v40, %v1327_v7 }
  0xaf   : > { %573 = vmatmul.f32.gmra.mxu2 %v1135_v57 }
  0xb0   : > { %788 = vmatmul.f32.gmra.mxu0 %v1117_v48  ;;  %v443_v35 = vadd.f32 %v1323_v3, %v290_v45 }
  0xb1   : > { %v474_v31 = vpop.f32.mrf.mxu3 }
  0xb2   : > { %v353_v37 = vpop.f32.mrf.mxu2 }
  0xb3   : > { %v354_v47 = vadd.f32 %v1307_v40, %v353_v37  ;;  %v1335_v17 = vpop.f32.mrf.mxu1 }
  0xb5   : > { %v1337_v24 = vadd.f32 %v474_v31, %v354_v47  ;;  %v1339_v33 = vpop.f32.mrf.mxu0 }
  0xb6   : > { %691 = vmatmul.f32.gmra.mxu3 %v357_v14  ;;  %877 = vmatmul.f32.gmra.mxu1 %v1149_v0 }
  0xb7   : > { %578 = vmatmul.f32.gmra.mxu2 %v1165_v9 }
  0xb8   : > { %792 = vmatmul.f32.gmra.mxu0 %v1149_v0 }
  0xb9   : > { %v478_v48 = vpop.f32.mrf.mxu3 }
  0xba   : > { %v361_v57 = vpop.f32.mrf.mxu2 }
  0xbb   : > { %v362_v63 = vadd.f32 %v1307_v40, %v361_v57  ;;  %v1347_v34 = vpop.f32.mrf.mxu1 }
  0xbd   : > { %v1349_v52 = vadd.f32 %v478_v48, %v362_v63  ;;  %v1351_v59 = vpop.f32.mrf.mxu0  ;;  %v298_v48 = vadd.f32 %v1307_v40, %v1339_v33 }
  0xbe   : > { %697 = vmatmul.f32.gmra.mxu3 %v365_v27  ;;  %881 = vmatmul.f32.gmra.mxu1 %v1177_v15 }
  0xbf   : > { %583 = vmatmul.f32.gmra.mxu2 %v1190_v21  ;;  %v447_v7 = vadd.f32 %v1335_v17, %v298_v48 }
  0xc0   : > { %796 = vmatmul.f32.gmra.mxu0 %v1177_v15 }
  0xc1   : > { %v482_v0 = vpop.f32.mrf.mxu3 }
  0xc2   : > { %v369_v9 = vpop.f32.mrf.mxu2 }
  0xc3   : > { %v370_v14 = vadd.f32 %v1307_v40, %v369_v9  ;;  %v1359_v61 = vpop.f32.mrf.mxu1 }
  0xc5   : > { %v1361_v62 = vadd.f32 %v482_v0, %v370_v14  ;;  %v1363_v1 = vpop.f32.mrf.mxu0 }
  0xc6   : > { %703 = vmatmul.f32.gmra.mxu3 %v373_v55  ;;  %885 = vmatmul.f32.gmra.mxu1 %v1201_v29  ;;  %v314_v20 = vadd.f32 %v1307_v40, %v1363_v1 }
  0xc7   : > { %588 = vmatmul.f32.gmra.mxu2 %v1214_v43 }
  0xc8   : > { %800 = vmatmul.f32.gmra.mxu0 %v1201_v29 }
  0xc9   : > { %v486_v15 = vpop.f32.mrf.mxu3 }
  0xca   : > { %v377_v21 = vpop.f32.mrf.mxu2 }
  0xcb   : > { %v378_v27 = vadd.f32 %v1307_v40, %v377_v21  ;;  %v1371_v6 = vpop.f32.mrf.mxu1 }
  0xcd   : > { %v1373_v8 = vadd.f32 %v486_v15, %v378_v27  ;;  %v1375_v5 = vpop.f32.mrf.mxu0  ;;  %v306_v27 = vadd.f32 %v1307_v40, %v1351_v59  ;;  %v455_v59 = vadd.f32 %v1359_v61, %v314_v20 }
  0xce   : > { %709 = vmatmul.f32.gmra.mxu3 %v381_v16  ;;  %889 = vmatmul.f32.gmra.mxu1 %v1225_v56 }
  0xcf   : > { %593 = vmatmul.f32.gmra.mxu2 %v1238_v4  ;;  %v451_v33 = vadd.f32 %v1347_v34, %v306_v27 }
  0xd0   : > { %804 = vmatmul.f32.gmra.mxu0 %v1225_v56 }
  0xd1   : > { %v490_v29 = vpop.f32.mrf.mxu3 }
  0xd2   : > { %v385_v43 = vpop.f32.mrf.mxu2 }
  0xd3   : > { %v386_v55 = vadd.f32 %v1307_v40, %v385_v43  ;;  %v1383_v10 = vpop.f32.mrf.mxu1 }
  0xd5   : > { %v1385_v12 = vadd.f32 %v490_v29, %v386_v55  ;;  %v1387_v13 = vpop.f32.mrf.mxu0 }
  0xd6   : > { %715 = vmatmul.f32.gmra.mxu3 %v389_v39  ;;  %893 = vmatmul.f32.gmra.mxu1 %v1247_v18 }
  0xd7   : > { %598 = vmatmul.f32.gmra.mxu2 %v1255_v25 }
  0xd8   : > { %808 = vmatmul.f32.gmra.mxu0 %v1247_v18  ;;  %v282_v18 = vadd.f32 %v1307_v40, %v1315_v41 }
  0xd9   : > { %v494_v56 = vpop.f32.mrf.mxu3 }
  0xda   : > { %v393_v4 = vpop.f32.mrf.mxu2  ;;  %v439_v53 = vadd.f32 %v1311_v51, %v282_v18 }
  0xdb   : > { %v394_v16 = vadd.f32 %v1307_v40, %v393_v4  ;;  %v834_v19 = vpop.f32.mrf.mxu1 }
  0xdd   : > { %v1397_v22 = vadd.f32 %v494_v56, %v394_v16  ;;  %v749_v23 = vpop.f32.mrf.mxu0 }
  0xe1   : > { %v626_v30 = vpop.f32.mrf.mxu3 }
  0xe2   : > { %v524_v36 = vpop.f32.mrf.mxu2 }
  0xe3   : > { %v525_v39 = vadd.f32 %v524_v36, %v435_v26  ;;  %v838_v25 = vpop.f32.mrf.mxu1 }
  0xe5   : > { %v627_v42 = vadd.f32 %v626_v30, %v525_v39  ;;  %v753_v46 = vpop.f32.mrf.mxu0 }
  0xe7   : > { %v750_v49 = vadd.f32 %v749_v23, %v627_v42  ;;  %v322_v42 = vadd.f32 %v1307_v40, %v1375_v5 }
  0xe9   : > { %v835_v54 = vadd.f32 %v834_v19, %v750_v49  ;;  %v632_v58 = vpop.f32.mrf.mxu3  ;;  %v459_v1 = vadd.f32 %v1371_v6, %v322_v42 }
  0xea   : > { %v529_v32 = vpop.f32.mrf.mxu2 }
  0xeb   : > { %897 = vst.msk [vmem:[%s1407_s4] sm:$0xff] %vm198_vm0, %v835_v54  ;;  %v530_v38 = vadd.f32 %v529_v32, %v439_v53  ;;  %v842_v44 = vpop.f32.mrf.mxu1 }
  0xed   : > { %v633_v50 = vadd.f32 %v632_v58, %v530_v38  ;;  %v757_v41 = vpop.f32.mrf.mxu0 }
  0xef   : > { %v754_v28 = vadd.f32 %v753_v46, %v633_v50 }
  0xf1   : > { %v839_v2 = vadd.f32 %v838_v25, %v754_v28  ;;  %v638_v31 = vpop.f32.mrf.mxu3 }
  0xf2   : > { %v534_v37 = vpop.f32.mrf.mxu2 }
  0xf3   : > { %898 = vst.msk [vmem:[%s1407_s4 + $0x8] sm:$0xff] %vm198_vm0, %v839_v2  ;;  %v535_v51 = vadd.f32 %v534_v37, %v443_v35  ;;  %v846_v47 = vpop.f32.mrf.mxu1 }
  0xf5   : > { %v639_v57 = vadd.f32 %v638_v31, %v535_v51  ;;  %v761_v63 = vpop.f32.mrf.mxu0 }
  0xf7   : > { %v758_v0 = vadd.f32 %v757_v41, %v639_v57 }
  0xf9   : > { %v843_v9 = vadd.f32 %v842_v44, %v758_v0  ;;  %v644_v14 = vpop.f32.mrf.mxu3  ;;  %v330_v44 = vadd.f32 %v1307_v40, %v1387_v13 }
  0xfa   : > { %v539_v15 = vpop.f32.mrf.mxu2 }
  0xfb   : > { %899 = vst.msk [vmem:[%s1407_s4 + $0x10] sm:$0xff] %vm198_vm0, %v843_v9  ;;  %v540_v3 = vadd.f32 %v539_v15, %v447_v7  ;;  %v850_v21 = vpop.f32.mrf.mxu1  ;;  %v463_v41 = vadd.f32 %v1383_v10, %v330_v44 }
  0xfd   : > { %v645_v29 = vadd.f32 %v644_v14, %v540_v3  ;;  %v765_v43 = vpop.f32.mrf.mxu0 }
  0xff   : > { %v762_v55 = vadd.f32 %v761_v63, %v645_v29 }
 0x101   : > { %v847_v56 = vadd.f32 %v846_v47, %v762_v55  ;;  %v650_v4 = vpop.f32.mrf.mxu3 }
 0x102   : > { %v544_v16 = vpop.f32.mrf.mxu2 }
 0x103   : > { %900 = vst.msk [vmem:[%s1407_s4 + $0x18] sm:$0xff] %vm198_vm0, %v847_v56  ;;  %v545_v17 = vadd.f32 %v544_v16, %v451_v33  ;;  %v854_v19 = vpop.f32.mrf.mxu1 }
 0x105   : > { %v651_v23 = vadd.f32 %v650_v4, %v545_v17  ;;  %v769_v26 = vpop.f32.mrf.mxu0 }
 0x107   : > { %v766_v30 = vadd.f32 %v765_v43, %v651_v23 }
 0x109   : > { %v851_v36 = vadd.f32 %v850_v21, %v766_v30  ;;  %v656_v39 = vpop.f32.mrf.mxu3 }
 0x10a   : > { %v549_v25 = vpop.f32.mrf.mxu2 }
 0x10b   : > { %901 = vst.msk [vmem:[%s1407_s4 + $0x20] sm:$0xff] %vm198_vm0, %v851_v36  ;;  %v550_v34 = vadd.f32 %v549_v25, %v455_v59  ;;  %v858_v18 = vpop.f32.mrf.mxu1 }
 0x10d   : > { %v657_v46 = vadd.f32 %v656_v39, %v550_v34  ;;  %v773_v49 = vpop.f32.mrf.mxu0 }
 0x10f   : > { %v770_v53 = vadd.f32 %v769_v26, %v657_v46 }
 0x111   : > { %v855_v54 = vadd.f32 %v854_v19, %v770_v53  ;;  %v662_v58 = vpop.f32.mrf.mxu3 }
 0x112   : > { %v554_v32 = vpop.f32.mrf.mxu2 }
 0x113   : > { %902 = vst.msk [vmem:[%s1407_s4 + $0x28] sm:$0xff] %vm198_vm0, %v855_v54  ;;  %v555_v61 = vadd.f32 %v554_v32, %v459_v1  ;;  %v862_v38 = vpop.f32.mrf.mxu1 }
 0x115   : > { %v663_v45 = vadd.f32 %v662_v58, %v555_v61  ;;  %v777_v50 = vpop.f32.mrf.mxu0 }
 0x117   : > { %v774_v5 = vadd.f32 %v773_v49, %v663_v45 }
 0x119   : > { %v859_v28 = vadd.f32 %v858_v18, %v774_v5  ;;  %v668_v35 = vpop.f32.mrf.mxu3 }
 0x11a   : > { %v559_v2 = vpop.f32.mrf.mxu2 }
 0x11b   : > { %903 = vst.msk [vmem:[%s1407_s4 + $0x30] sm:$0xff] %vm198_vm0, %v859_v28  ;;  %v560_v6 = vadd.f32 %v559_v2, %v463_v41  ;;  %v866_v31 = vpop.f32.mrf.mxu1 }
 0x11d   : > { %v669_v37 = vadd.f32 %v668_v35, %v560_v6  ;;  %v781_v51 = vpop.f32.mrf.mxu0 }
 0x11f   : > { %v778_v47 = vadd.f32 %v777_v50, %v669_v37 }
 0x121   : > { %v863_v48 = vadd.f32 %v862_v38, %v778_v47  ;;  %v674_v57 = vpop.f32.mrf.mxu3 }
 0x122   : > { %v564_v40 = vpop.f32.mrf.mxu2 }
 0x123   : > { %904 = vst.msk [vmem:[%s1407_s4 + $0x38] sm:$0xff] %vm198_vm0, %v863_v48  ;;  %v565_v13 = vadd.f32 %v564_v40, %v1313_v60  ;;  %v870_v63 = vpop.f32.mrf.mxu1 }
 0x125   : > { %v675_v10 = vadd.f32 %v674_v57, %v565_v13  ;;  %v785_v0 = vpop.f32.mrf.mxu0 }
 0x127   : > { %v782_v7 = vadd.f32 %v781_v51, %v675_v10 }
 0x129   : > { %v867_v9 = vadd.f32 %v866_v31, %v782_v7  ;;  %v680_v14 = vpop.f32.mrf.mxu3 }
 0x12a   : > { %v569_v15 = vpop.f32.mrf.mxu2 }
 0x12b   : > { %905 = vst.msk [vmem:[%s1407_s4 + $0x40] sm:$0xff] %vm198_vm0, %v867_v9  ;;  %v570_v3 = vadd.f32 %v569_v15, %v1325_v11  ;;  %v874_v21 = vpop.f32.mrf.mxu1 }
 0x12d   : > { %v681_v27 = vadd.f32 %v680_v14, %v570_v3  ;;  %v789_v29 = vpop.f32.mrf.mxu0 }
 0x12f   : > { %v786_v43 = vadd.f32 %v785_v0, %v681_v27 }
 0x131   : > { %v871_v55 = vadd.f32 %v870_v63, %v786_v43  ;;  %v686_v33 = vpop.f32.mrf.mxu3 }
 0x132   : > { %v574_v60 = vpop.f32.mrf.mxu2 }
 0x133   : > { %906 = vst.msk [vmem:[%s1407_s4 + $0x48] sm:$0xff] %vm198_vm0, %v871_v55  ;;  %v575_v56 = vadd.f32 %v574_v60, %v1337_v24  ;;  %v878_v17 = vpop.f32.mrf.mxu1 }
 0x135   : > { %v687_v4 = vadd.f32 %v686_v33, %v575_v56  ;;  %v793_v16 = vpop.f32.mrf.mxu0 }
 0x137   : > { %v790_v19 = vadd.f32 %v789_v29, %v687_v4 }
 0x139   : > { %v875_v20 = vadd.f32 %v874_v21, %v790_v19  ;;  %v692_v23 = vpop.f32.mrf.mxu3 }
 0x13a   : > { %v579_v11 = vpop.f32.mrf.mxu2 }
 0x13b   : > { %907 = vst.msk [vmem:[%s1407_s4 + $0x50] sm:$0xff] %vm198_vm0, %v875_v20  ;;  %v580_v26 = vadd.f32 %v579_v11, %v1349_v52  ;;  %v882_v39 = vpop.f32.mrf.mxu1 }
 0x13d   : > { %v693_v30 = vadd.f32 %v692_v23, %v580_v26  ;;  %v797_v59 = vpop.f32.mrf.mxu0 }
 0x13f   : > { %v794_v36 = vadd.f32 %v793_v16, %v693_v30 }
 0x141   : > { %v879_v25 = vadd.f32 %v878_v17, %v794_v36  ;;  %v698_v34 = vpop.f32.mrf.mxu3 }
 0x142   : > { %v584_v24 = vpop.f32.mrf.mxu2 }
 0x143   : > { %908 = vst.msk [vmem:[%s1407_s4 + $0x58] sm:$0xff] %vm198_vm0, %v879_v25  ;;  %v585_v18 = vadd.f32 %v584_v24, %v1361_v62  ;;  %v886_v52 = vpop.f32.mrf.mxu1 }
 0x145   : > { %v699_v42 = vadd.f32 %v698_v34, %v585_v18  ;;  %v801_v49 = vpop.f32.mrf.mxu0 }
 0x147   : > { %v798_v46 = vadd.f32 %v797_v59, %v699_v42 }
 0x149   : > { %v883_v53 = vadd.f32 %v882_v39, %v798_v46  ;;  %v704_v1 = vpop.f32.mrf.mxu3 }
 0x14a   : > { %v589_v54 = vpop.f32.mrf.mxu2 }
 0x14b   : > { %909 = vst.msk [vmem:[%s1407_s4 + $0x60] sm:$0xff] %vm198_vm0, %v883_v53  ;;  %v590_v58 = vadd.f32 %v589_v54, %v1373_v8  ;;  %v890_v5 = vpop.f32.mrf.mxu1 }
 0x14d   : > { %v705_v32 = vadd.f32 %v704_v1, %v590_v58  ;;  %v805_v50 = vpop.f32.mrf.mxu0 }
 0x14f   : > { %v802_v61 = vadd.f32 %v801_v49, %v705_v32 }
 0x151   : > { %v887_v38 = vadd.f32 %v886_v52, %v802_v61  ;;  %v710_v44 = vpop.f32.mrf.mxu3 }
 0x152   : > { %v594_v45 = vpop.f32.mrf.mxu2 }
 0x153   : > { %910 = vst.msk [vmem:[%s1407_s4 + $0x68] sm:$0xff] %vm198_vm0, %v887_v38  ;;  %v595_v62 = vadd.f32 %v594_v45, %v1385_v12  ;;  %v894_v51 = vpop.f32.mrf.mxu1 }
 0x155   : > { %v711_v41 = vadd.f32 %v710_v44, %v595_v62  ;;  %v809_v31 = vpop.f32.mrf.mxu0 }
 0x157   : > { %v806_v28 = vadd.f32 %v805_v50, %v711_v41 }
 0x159   : > { %v891_v35 = vadd.f32 %v890_v5, %v806_v28  ;;  %v716_v6 = vpop.f32.mrf.mxu3 }
 0x15a   : > { %v599_v2 = vpop.f32.mrf.mxu2 }
 0x15b   : > { %911 = vst.msk [vmem:[%s1407_s4 + $0x70] sm:$0xff] %vm198_vm0, %v891_v35  ;;  %v600_v8 = vadd.f32 %v599_v2, %v1397_v22 }
 0x15d   : > { %v717_v37 = vadd.f32 %v716_v6, %v600_v8 }
 0x15f   : > { %v810_v47 = vadd.f32 %v809_v31, %v717_v37 }
 0x161   : > { %v895_v48 = vadd.f32 %v894_v51, %v810_v47 }
 0x163   : > { %912 = vst.msk [vmem:[%s1407_s4 + $0x78] sm:$0xff] %vm198_vm0, %v895_v48 }
 0x164 PF: > { %s13_s12 = sadd.s32 1, %s1003_s12  }
 0x165   : > { %p10_p4 = scmp.ge.s32.totalorder %s13_s12, 4  }
 0x167   :  { %12 = sbr.rel (!%p10_p4) target bundleno = 1 (0x1), region = 62 }

</bundles_post_ra>
